<compile_context>
chip_gen: v7x
topology: tpu7x:2x2x1
jax: 0.10.0
libtpu: 0.0.40
codegen_flags: <defaults>
</compile_context>

<pallas_src>
import functools
import math

import jax
import jax.numpy as jnp
from jax.experimental import pallas as pl
from jax.experimental.pallas import tpu as pltpu


def _round_up(x: int, m: int) -> int:
    return ((x + m - 1) // m) * m


def _choose_tile_co(c_out_g: int) -> int:
    """Output-channel block (<=128 rows so the f32 accumulator stays in vregs)."""
    if c_out_g <= 128:
        return c_out_g
    for cand in (128, 64, 32, 16, 8):
        if c_out_g % cand == 0:
            return cand
    return c_out_g


def _choose_tile_lo(l_out: int, tile_co: int) -> int:
    """Lane tile: multiple of 128, <=1024, acc <= ~32K f32, minimal padding."""
    l128 = _round_up(l_out, 128)
    cap = max(128, (32768 // max(tile_co, 1)) // 128 * 128)
    hi = min(1024, cap, l128)
    best_key, best_t = None, 128
    for t in range(128, hi + 1, 128):
        pad = _round_up(l_out, t)
        key = (pad, pad // t)          # minimize padded length, then #tiles
        if best_key is None or key < best_key:
            best_key, best_t = key, t
    return best_t


def _conv_same_kernel(x_ref, w_ref, b_ref, o_ref, *,
                      k, stride, tile_lo, q_max, c_in_g, taps_per_dot):
    # x_ref: (stride, C_in_g, L_ph)   phase-decomposed padded input (resident)
    # w_ref: (TILE_CO, k*C_in_g)      fused-tap weight (tap-major, chan-minor)
    # b_ref: (TILE_CO, 1)             bias
    # o_ref: (TILE_CO, tile_lo)       lane-dense output tile
    t = pl.program_id(3)
    base = pl.multiple_of(t * tile_lo, tile_lo)      # 128-aligned tile start
    win_w = tile_lo + q_max

    # One aligned window load per *phase* actually used; taps are static
    # sub-slices of these windows (no unaligned dynamic slices).
    used_phases = sorted({j % stride for j in range(k)})
    wins = {ph: x_ref[ph, :, pl.ds(base, win_w)] for ph in used_phases}

    # Fused-tap matmul: stack taps along the contraction dim and do one MXU
    # dot (chunked only when k*C_in_g is much larger than the MXU K width).
    acc = None
    for c0 in range(0, k, taps_per_dot):
        taps = list(range(c0, min(k, c0 + taps_per_dot)))
        pieces = []
        for j in taps:
            q = j // stride
            pieces.append(wins[j % stride][:, q:q + tile_lo])
        xs = pieces[0] if len(pieces) == 1 else jnp.concatenate(pieces, axis=0)
        w_blk = w_ref[:, c0 * c_in_g:(c0 + len(taps)) * c_in_g]
        d = jnp.dot(w_blk, xs, preferred_element_type=jnp.float32)
        acc = d if acc is None else acc + d

    # Single bias add per tile (negligible; everything else stays in the MXU).
    o_ref[...] = (acc + b_ref[...].astype(jnp.float32)).astype(o_ref.dtype)


def my_conv1d_pad_same(x, weight, bias, stride: int, groups: int = 1):
    """SAME-padded 1D convolution matching MyConv1dPadSame.forward.

    x:      (N, C_in, L)
    weight: (C_out, C_in // groups, k)   -- torch Conv1d weight layout
    bias:   (C_out,)
    returns (N, C_out, L_out) with L_out = ceil(L / stride)
    """
    N, C_in, L = x.shape
    C_out, C_in_g, k = weight.shape
    G = int(groups)
    stride = int(stride)
    assert C_in % G == 0 and C_out % G == 0 and C_in // G == C_in_g
    C_out_g = C_out // G

    # --- SAME padding arithmetic (identical to the PyTorch module) ----------
    out_dim = (L + stride - 1) // stride
    pad_total = max(0, (out_dim - 1) * stride + k - L)
    pad_left = pad_total // 2
    Lp = L + pad_total
    L_out = (Lp - k) // stride + 1          # torch floor-mode conv length

    # --- tiling --------------------------------------------------------------
    TILE_CO = _choose_tile_co(C_out_g)
    n_co = C_out_g // TILE_CO
    TILE_LO = _choose_tile_lo(L_out, TILE_CO)
    L_out_pad = _round_up(L_out, TILE_LO)
    n_t = L_out_pad // TILE_LO

    # --- phase-decomposed padded input ---------------------------------------
    # raw padded index i = q*stride + ph; tap j of output o reads raw index
    # o*stride + j == (o + j//stride)*stride + (j % stride).
    q_max = (k - 1) // stride
    L_ph = L_out_pad + q_max
    Lp_target = stride * L_ph
    # Last raw index torch reads is (L_out-1)*stride + k - 1 < Lp <= Lp_target;
    # indices beyond Lp are zero pad read only by discarded output columns.
    assert Lp_target >= Lp, (Lp_target, Lp)
    assert (L_out - 1) * stride + k - 1 < Lp, "conv read past padded input"

    right = Lp_target - pad_left - L        # >= torch pad_right, rest is zero
    xp = jnp.pad(x, ((0, 0), (0, 0), (pad_left, right)), constant_values=0)

    if stride == 1:
        x_ph = xp.reshape(N, G, 1, C_in_g, L_ph)          # pure reshape
    else:
        # TODO(synk): fuse this phase transpose into the kernel via strided
        # lane loads to save one HBM pass on downsample layers.
        x_ph = xp.reshape(N, G, C_in_g, L_ph, stride).transpose(0, 1, 4, 2, 3)
    # (N, G, stride, C_in_g, L_ph)

    # --- fused-tap weights / bias --------------------------------------------
    K_total = k * C_in_g
    w = (weight.reshape(G, C_out_g, C_in_g, k)
               .transpose(0, 1, 3, 2)                      # tap-major
               .reshape(G, C_out_g, K_total))
    b = bias.reshape(G, C_out_g, 1)

    # Chunk taps so each dot's contraction stays near the 256-wide MXU.
    taps_per_dot = max(1, min(k, 256 // max(C_in_g, 1)))

    # --- VMEM budgeting -------------------------------------------------------
    itemsize = jnp.dtype(x.dtype).itemsize
    slab_bytes = stride * C_in_g * L_ph * itemsize
    x_spec_kw = {}
    if 2 * slab_bytes > 24 * (1 << 20):
        # Long-sequence / wide-channel layers: single-buffer the resident slab
        # so the default double-buffering cannot blow v7x's 64 MiB VMEM.
        x_spec_kw["pipeline_mode"] = pl.Buffered(1)
    x_bufs = 1 if x_spec_kw else 2
    vmem_need = (x_bufs * slab_bytes
                 + 2 * TILE_CO * K_total * itemsize            # weight blocks
                 + 2 * TILE_CO * itemsize                       # bias blocks
                 + 2 * TILE_CO * TILE_LO * itemsize             # output tiles
                 + TILE_CO * TILE_LO * 4                        # f32 acc
                 + min(taps_per_dot * C_in_g, K_total)
                   * (TILE_LO + q_max) * 4)                     # stacked operand
    vmem_limit = int(min(100 * (1 << 20), max(32 * (1 << 20), 2 * vmem_need)))

    cost = pl.CostEstimate(
        flops=2 * N * C_out * C_in_g * k * L_out,
        transcendentals=0,
        bytes_accessed=(x_ph.size + w.size + b.size) * itemsize
                       + N * C_out * L_out_pad * itemsize,
    )

    kernel = functools.partial(_conv_same_kernel, k=k, stride=stride,
                               tile_lo=TILE_LO, q_max=q_max, c_in_g=C_in_g,
                               taps_per_dot=taps_per_dot)

    common = dict(
        grid=(N, G, n_co, n_t),
        in_specs=[
            # full (stride, C_in_g, L_ph) slab per (n, g); index map ignores
            # (co, t) so the block stays resident across those axes.
            pl.BlockSpec((None, None, stride, C_in_g, L_ph),
                         lambda n, g, co, t: (n, g, 0, 0, 0), **x_spec_kw),
            pl.BlockSpec((None, TILE_CO, K_total),
                         lambda n, g, co, t: (g, co, 0)),
            pl.BlockSpec((None, TILE_CO, 1),
                         lambda n, g, co, t: (g, co, 0)),
        ],
        compiler_params=pltpu.CompilerParams(
            dimension_semantics=("parallel",) * 4,
            vmem_limit_bytes=vmem_limit),
        cost_estimate=cost,
    )

    # Direct (N, C_out, L) output layout when the channel block is
    # (8,128)-legal; otherwise fall back to the grouped 4-D layout + reshape.
    direct = (TILE_CO % 8 == 0) or (G * n_co == 1)
    if direct:
        out = pl.pallas_call(
            kernel,
            out_shape=jax.ShapeDtypeStruct((N, C_out, L_out_pad), x.dtype),
            out_specs=pl.BlockSpec((None, TILE_CO, TILE_LO),
                                   lambda n, g, co, t: (n, g * n_co + co, t)),
            **common)(x_ph, w, b)
        return out if L_out_pad == L_out else out[..., :L_out]
    else:
        out = pl.pallas_call(
            kernel,
            out_shape=jax.ShapeDtypeStruct((N, G, C_out_g, L_out_pad), x.dtype),
            out_specs=pl.BlockSpec((None, None, TILE_CO, TILE_LO),
                                   lambda n, g, co, t: (n, g, co, t)),
            **common)(x_ph, w, b)
        return out[..., :L_out].reshape(N, C_out, L_out)


def _reference(x, weight, bias, stride, groups):
    """Pure-JAX replica of MyConv1dPadSame.forward for verification."""
    N, C_in, L = x.shape
    k = weight.shape[-1]
    out_dim = (L + stride - 1) // stride
    p = max(0, (out_dim - 1) * stride + k - L)
    pad_left = p // 2
    pad_right = p - pad_left
    xp = jnp.pad(x, ((0, 0), (0, 0), (pad_left, pad_right)),
                 constant_values=0)
    y = jax.lax.conv_general_dilated(
        xp, weight, window_strides=(stride,), padding="VALID",
        dimension_numbers=("NCH", "OIH", "NCH"),
        feature_group_count=groups)
    return y + bias[None, :, None]


if __name__ == "__main__":
    key = jax.random.PRNGKey(0)

    cases = [
        # (N, C_in, C_out, L, k, stride, groups)
        (2, 8, 16, 16, 3, 1, 1),      # plain SAME conv, stride 1
        (2, 16, 16, 16, 5, 2, 2),     # strided + grouped downsample conv
        (2, 16, 24, 50, 7, 3, 4),     # grouped, stride 3, non-8-aligned chans
    ]
    for (N, C_in, C_out, L, k, stride, groups) in cases:
        key, kx, kw, kb = jax.random.split(key, 4)
        x = jax.random.normal(kx, (N, C_in, L), dtype=jnp.float32)
        w = jax.random.normal(kw, (C_out, C_in // groups, k),
                              dtype=jnp.float32) / math.sqrt(C_in * k)
        b = jax.random.normal(kb, (C_out,), dtype=jnp.float32)

        out = my_conv1d_pad_same(x, w, b, stride=stride, groups=groups)
        out = jax.block_until_ready(out)

        ref = _reference(x, w, b, stride, groups)
        assert out.shape == ref.shape, (out.shape, ref.shape)
        err = jnp.max(jnp.abs(out - ref))
        assert jnp.allclose(out, ref, atol=2e-2, rtol=2e-2), (
            f"Pallas conv mismatch vs reference, max |err| = {err}")

    print("KERNEL_OK")
</pallas_src>

<mosaic_0001>
module attributes {stable_mosaic.version = 11 : i64} {
  func.func @_conv_same_kernel(%arg0: i32, %arg1: i32, %arg2: i32, %arg3: i32, %arg4: memref<1x1x1x8x130xf32, #tpu.memory_space<vmem>>, %arg5: memref<1x16x24xf32, #tpu.memory_space<vmem>>, %arg6: memref<1x16x1xf32, #tpu.memory_space<vmem>>, %arg7: memref<1x16x128xf32, #tpu.memory_space<vmem>>) attributes {dimension_semantics = [#tpu.dimension_semantics<parallel>, #tpu.dimension_semantics<parallel>, #tpu.dimension_semantics<parallel>, #tpu.dimension_semantics<parallel>], iteration_bounds = array<i64: 2, 1, 1, 1>, scalar_prefetch = 0 : i64, scratch_operands = 0 : i64, tpu.core_type = #tpu.core_type<tc>, window_params = [{transform_indices = @transform_0, window_bounds = array<i64: 1, 1, 1, 8, 130>}, {transform_indices = @transform_1, window_bounds = array<i64: 1, 16, 24>}, {transform_indices = @transform_2, window_bounds = array<i64: 1, 16, 1>}, {transform_indices = @transform_3, window_bounds = array<i64: 1, 16, 128>}]} {
    %c128_i32 = arith.constant 128 : i32
    %0 = arith.muli %arg3, %c128_i32 : i32
    %1 = tpu.assume_multiple %0, 128 : i32
    %c0 = arith.constant 0 : index
    %c0_0 = arith.constant 0 : index
    %c0_1 = arith.constant 0 : index
    %c0_2 = arith.constant 0 : index
    %2 = arith.index_cast %1 : i32 to index
    %3 = vector.load %arg4[%c0, %c0_0, %c0_1, %c0_2, %2] : memref<1x1x1x8x130xf32, #tpu.memory_space<vmem>>, vector<1x1x1x8x130xf32>
    %4 = vector.shape_cast %3 : vector<1x1x1x8x130xf32> to vector<8x130xf32>
    %5 = vector.extract_strided_slice %4 {offsets = [0, 0], sizes = [8, 128], strides = [1, 1]} : vector<8x130xf32> to vector<8x128xf32>
    %6 = vector.extract_strided_slice %4 {offsets = [0, 1], sizes = [8, 128], strides = [1, 1]} : vector<8x130xf32> to vector<8x128xf32>
    %7 = vector.extract_strided_slice %4 {offsets = [0, 2], sizes = [8, 128], strides = [1, 1]} : vector<8x130xf32> to vector<8x128xf32>
    %8 = tpu.concatenate %5, %6, %7 in 0 : vector<8x128xf32>, vector<8x128xf32>, vector<8x128xf32> -> vector<24x128xf32>
    %c0_3 = arith.constant 0 : index
    %c0_4 = arith.constant 0 : index
    %c0_5 = arith.constant 0 : index
    %9 = vector.load %arg5[%c0_3, %c0_4, %c0_5] : memref<1x16x24xf32, #tpu.memory_space<vmem>>, vector<1x16x24xf32>
    %10 = vector.shape_cast %9 : vector<1x16x24xf32> to vector<16x24xf32>
    %cst = arith.constant dense<0.000000e+00> : vector<16x128xf32>
    %11 = tpu.matmul %10, %8, %cst {dimension_numbers = #tpu.dot_dimension_numbers<[1], [0], [0], [1], [0, 0, 1, 1], [], []>} : vector<16x24xf32>, vector<24x128xf32>, vector<16x128xf32> -> vector<16x128xf32>
    %c0_6 = arith.constant 0 : index
    %c0_7 = arith.constant 0 : index
    %c0_8 = arith.constant 0 : index
    %12 = vector.load %arg6[%c0_6, %c0_7, %c0_8] : memref<1x16x1xf32, #tpu.memory_space<vmem>>, vector<1x16x1xf32>
    %13 = vector.shape_cast %12 : vector<1x16x1xf32> to vector<16x1xf32>
    %14 = vector.broadcast %13 : vector<16x1xf32> to vector<16x128xf32>
    %15 = arith.addf %11, %14 : vector<16x128xf32>
    %c0_9 = arith.constant 0 : index
    %c0_10 = arith.constant 0 : index
    %c0_11 = arith.constant 0 : index
    %16 = vector.load %arg7[%c0_9, %c0_10, %c0_11] : memref<1x16x128xf32, #tpu.memory_space<vmem>>, vector<1x16x128xf32>
    %17 = vector.shape_cast %16 : vector<1x16x128xf32> to vector<16x128xf32>
    %18 = vector.shape_cast %15 : vector<16x128xf32> to vector<1x16x128xf32>
    tpu.vector_store %arg7[%c0_9, %c0_10, %c0_11], %18 {strides = array<i32>} : memref<1x16x128xf32, #tpu.memory_space<vmem>>, vector<1x16x128xf32>,
    return
  }
  func.func @transform_0(%arg0: i32, %arg1: i32, %arg2: i32, %arg3: i32) -> (i32, i32, i32, i32, i32) {
    %c0_i32 = arith.constant 0 : i32
    %c0_i32_0 = arith.constant 0 : i32
    %c0_i32_1 = arith.constant 0 : i32
    %c0_i32_2 = arith.constant 0 : i32
    return %arg0, %arg1, %c0_i32, %c0_i32_0, %c0_i32_1 : i32, i32, i32, i32, i32
  }
  func.func @transform_1(%arg0: i32, %arg1: i32, %arg2: i32, %arg3: i32) -> (i32, i32, i32) {
    %c0_i32 = arith.constant 0 : i32
    %c0_i32_0 = arith.constant 0 : i32
    return %arg1, %arg2, %c0_i32 : i32, i32, i32
  }
  func.func @transform_2(%arg0: i32, %arg1: i32, %arg2: i32, %arg3: i32) -> (i32, i32, i32) {
    %c0_i32 = arith.constant 0 : i32
    %c0_i32_0 = arith.constant 0 : i32
    return %arg1, %arg2, %c0_i32 : i32, i32, i32
  }
  func.func @transform_3(%arg0: i32, %arg1: i32, %arg2: i32, %arg3: i32) -> (i32, i32, i32) {
    %c1_i32 = arith.constant 1 : i32
    %0 = arith.muli %arg1, %c1_i32 : i32
    %1 = arith.addi %0, %arg2 : i32
    %c0_i32 = arith.constant 0 : i32
    return %arg0, %1, %arg3 : i32, i32, i32
  }
}

</mosaic_0001>

<bundles_post_ra>
// kernel: tpu_custom_call.1
= control target key start
LH: loop header
LB: loop body
LE: loop exit
PB: predicated region body
PF: predicated region fallthrough
CT: control target
= control target key end

     0   :  { %8 = vsyncpa [#allocation3], 0  ;;  %s1021_s0 = inlined_call_operand.hbm [shape: f32[2,1,1,8,130], index: 0, kind: input, shape index: {}]   ;;  %s1022_s1 = inlined_call_operand.vmem [shape: f32[1,16,24], index: 1, kind: input, shape index: {}]   ;;  %s1023_s2 = inlined_call_operand.vmem [shape: f32[1,16,1], index: 2, kind: input, shape index: {}]   ;;  %s1024_s3 = inlined_call_operand.hbm [shape: f32[2,16,128], index: 3, kind: output, shape index: {}]  }
   0x1   :  { %10 = vsyncpa [#allocation3 + $0x1], 0 }
   0x2   :  { %11 = vsyncpa [#allocation4], 0 }
   0x3   :  { %13 = vsyncpa [#allocation4 + $0x1], 0  ;;  %s829_s12 = smov 0   ;;  %s831_s13 = smov 0  }
   0x4   :  { %s833_s14 = smov 0   ;;  %s835_s15 = smov 0  }
   0x5   :  { %s837_s16 = smov 0   ;;  %s839_s17 = smov 0  }
   0x6 LB: > { %s575_s18 = sadd.s32 4294967295, %s800_s17   ;;  %s576_s19 = sadd.s32 4294967294, %s800_s17   ;;  %s800_s17 = sphi %s839_s17, %s19_s17   ;;  %s796_s16 = sphi %s837_s16, %s1040_s16   ;;  %s792_s15 = sphi %s835_s15, %s1039_s15   ;;  %s788_s14 = sphi %s833_s14, %s1038_s14   ;;  %s784_s13 = sphi %s831_s13, %s1037_s13   ;;  %s780_s12 = sphi %s829_s12, %s1036_s12  }
   0x7   : > { %s45_s20 = sadd.s32 1, %s796_s16  ;;  %s54_s21 = sadd.s32 1, %s788_s14 }
   0x8   : > { %p47_p0 = scmp.ge.s32.totalorder %s45_s20, 2  ;;  %p61_p1 = scmp.ne.s32.totalorder %s788_s14, %s784_s13 }
   0x9   : > { %p62_p2 = scmp.eq.s32.totalorder %s800_s17, 0  ;;  %p67_p3 = scmp.ne.s32.totalorder %s784_s13, %s780_s12 }
   0xa   : > { %s1042_s20 = smov (%p47_p0, %s45_s20), 0  ;;  %p68_p5 = scmp.eq.s32.totalorder %s575_s18, 0 }
   0xb   : > { %p870_p4 = por %p62_p2, %p61_p1  ;;  %s49_s23 = ssub.s32 %s796_s16, %s1042_s20 }
   0xc   : > { %p153_p6 = scmp.eq.s32.totalorder %s575_s18, 1  ;;  %p52_p7 = scmp.eq.s32.totalorder %s49_s23, 0 }
   0xd   : > { %p876_p8 = por %p68_p5, %p67_p3  ;;  %p159_p10 = scmp.eq.s32.totalorder %s576_s19, 1 }
   0xe   : > { %p880_p9 = por %p153_p6, %p61_p1  ;;  %p626_p13 = scmp.lt.s32.totalorder %s800_s17, 2 }
   0xf   : > { %s885_s26 = scalar_select %p52_p7, %s788_s14, %s54_s21  }
  0x10   : > { %s1028_s25 = scalar_select %p880_p9, 1, 0 }
  0x11   : > { %p887_p11 = por %p159_p10, %p67_p3  ;;  %s205_s28 = sand.u32 1, %s788_s14  }
  0x12   : > { %s581_s29 = sshll.u32 %s205_s28, 4  ;;  %s594_s30 = sshll.u32 %s796_s16, 8 }
  0x13   : > { %s1029_s27 = scalar_select %p887_p11, 1, 0 }
  0x14   : > { %s898_s6 = scalar_lea.hbm %s1021_s0, %s594_s30  ;;  %s209_s7 = scalar_lea.vmem [#allocation2], %s581_s29 }
  0x15   : > { %s219_s8 = sshll.u32 %s209_s7, 4  ;;  %p904_p0 = pnand %p626_p13, %p870_p4  ;;  %s900_s8 = int_to_ptr.vmem [resolvable:$true] %s219_s8 }
  0x16   : > { %s206_s10 = scalar_lea.sflag [#allocation3], %s205_s28  ;;  %s688_s11 = scalar_lea.hbm %s898_s6, 256 }
  0x17   : > { %p689_p3 = scmp.ne.s32.totalorder %s898_s6, %s688_s11  ;;  %p690_p5 = pneg %p904_p0 }
  0x18   : > { %s693_s21 = scalar_lea.hbm %s1021_s0, 512  ;;  %p694_p4 = scmp.lt.u32.totalorder %s898_s6, %s1021_s0 }
  0x19   : > { %p691_p6 = pnand %p690_p5, %p689_p3  ;;  %p695_p10 = scmp.lt.u32.totalorder %s693_s21, %s688_s11 }
  0x1a   : > { %p697_p12 = scmp.lt.u32.totalorder %s688_s11, %s898_s6 }
  0x1b   : > { %p692_p7 = pneg %p691_p6  ;;  %p696_p13 = por %p695_p10, %p694_p4 }
  0x1d   : > { %p698_p1 = por %p697_p12, %p696_p13 }
  0x1f   : > { %p699_p2 = pnand %p698_p1, %p692_p7 }
  0x21   : > { %702 = shalt.err (!%p699_p2)
}
  0x22   : > { %s703_s28 = scalar_lea.vmem %s900_s8, 256  ;;  %s802_s29 = smov [#allocation2]  }
  0x23   : > { %p704_p3 = scmp.ne.s32.totalorder %s900_s8, %s703_s28  ;;  %s708_s30 = sshll.u32 %s802_s29, 4  ;;  %s709_s30 = int_to_ptr.vmem [resolvable:$false] %s708_s30 }
  0x24   : > { %s710_s4 = scalar_lea.vmem %s709_s30, 512  ;;  %p711_p9 = scmp.lt.s32.totalorder %s900_s8, %s709_s30 }
  0x25   : > { %p706_p6 = pnand %p704_p3, %p690_p5  ;;  %p712_p4 = scmp.lt.s32.totalorder %s710_s4, %s703_s28 }
  0x27   : > { %p707_p11 = pneg %p706_p6  ;;  %p713_p10 = por %p712_p4, %p711_p9 }
  0x29   : > { %p714_p12 = pnand %p713_p10, %p707_p11 }
  0x2b   : > { %717 = shalt.err (!%p714_p12)
}
  0x2c   : > { %621 = dma.hbm_to_vmem [thread:$0]  (!%p904_p0), %s898_s6, 256, %s900_s8, %s206_s10  }
  0x2d   : > { %p1031_p1 = scmp.lt.s32.totalorder %s800_s17, 3  ;;  %p1032_p2 = scmp.ge.s32.totalorder %s800_s17, 1 }
  0x2f   : > { %p225_p5 = pnand %p1032_p2, %p1031_p1 }
  0x30   : > { %s940_s5 = sand.u32 (!%p225_p5), 1, %s784_s13  }
  0x31   : > { %228 = sbr.rel (%p225_p5) target bundleno = 416 (0x1a0), region = 32  ;;  %s585_s7 = sshll.u32 (!%p225_p5), %s940_s5, 4 }
  0x32   : > { %s231_s11 = scalar_lea.sflag (!%p225_p5), [#allocation3], %s940_s5  ;;  %s234_s9 = scalar_lea.vmem (!%p225_p5), [#allocation2], %s585_s7 }
  0x38   : > { %771 = dma.done.wait (%p876_p8), %s231_s11, 256  }
  0x39   : > { %773 = vsyncadd (%p876_p8), %s231_s11, 4294967040  ;;  %vm334_vm0 = vcmask 195584   ;;  %v302_v0 = vld [vmem:[%s234_s9] sm:$0xff]  ;;  %v303_v1 = vld [vmem:[%s234_s9 + $0x8] sm:$0xff]  ;;  %s803_s10 = smov 126   ;;  %v804_v4 = vmov 0  }
  0x3a   : > { %v320_v2 = vld [vmem:[%s1022_s1] sm:$0xff]  ;;  %v681_v3 = vpack.i.bf16 %v303_v1, %v302_v0  ;;  %315 = vrot.lane.b32.xlu1 %v303_v1, %s803_s10  ;;  %687 = vset.pattern.permute.xlu0 %v804_v4  ;;  %s805_s24 = smov 127   ;;  %v323_v6 = vld [vmem:[%s1023_s2 + $0x8] sm:$0xff]  ;;  %vm310_vm1 = vcmask 1039360   ;;  %vm317_vm2 = vcmask 1031168   ;;  %s274_s29 = scalar_lea.vmem [#allocation5], %s585_s7 }
  0x3b   : > { %607 = vmatprep.mubr.msk.f32.mxu0 %vm334_vm0, %v320_v2  ;;  %686 = vset.pattern.permute.xlu1 %v804_v4  ;;  %v322_v5 = vld [vmem:[%s1023_s2] sm:$0xff]  ;;  %v321_v15 = vld [vmem:[%s1022_s1 + $0x8] sm:$0xff]  ;;  %s436_s30 = sshll.u32 %s274_s29, 4  ;;  %s595_s4 = sshll.u32 %s792_s15, 8  ;;  %s967_s30 = int_to_ptr.vmem [resolvable:$true] %s436_s30 }
  0x3c   : > { %682 = vrot.lane.b32.xlu0 %v681_v3, %s805_s24  ;;  %s972_s6 = scalar_lea.hbm %s1024_s3, %s595_s4  ;;  %s419_s7 = scalar_lea.sflag [#allocation4], %s940_s5 }
  0x3d   : > { %s718_s8 = scalar_lea.vmem %s967_s30, 256  ;;  %p1033_p9 = scmp.ne.s32.totalorder %s1028_s25, 0 }
  0x3e   : > { %326 = vperm.xlu1 %686, %v322_v5   ;;  %p719_p8 = scmp.ne.s32.totalorder %s967_s30, %s718_s8  ;;  %s806_s15 = smov [#allocation5]  }
  0x40   : > { %313 = vrot.lane.b32.xlu0 %v302_v0, %s803_s10  ;;  %p720_p11 = pnand %p719_p8, %p1033_p9  ;;  %s722_s10 = sshll.u32 %s806_s15, 4  ;;  %s723_s10 = int_to_ptr.vmem [resolvable:$false] %s722_s10 }
  0x41   : > { %s724_s18 = scalar_lea.vmem %s723_s10, 512  ;;  %p725_p7 = scmp.lt.s32.totalorder %s967_s30, %s723_s10 }
  0x42   : > { %p721_p0 = pneg %p720_p11  ;;  %p726_p13 = scmp.lt.s32.totalorder %s724_s18, %s718_s8 }
  0x44   : > { %331 = vperm.xlu0 %687, %v323_v6   ;;  %p727_p3 = por %p726_p13, %p725_p7 }
  0x46   : > { %p728_p6 = pnand %p727_p3, %p721_p0 }
  0xac   : > { %v316_v10 = vpop.permute.xlu1 %315 }
  0xae   : > { %v683_v7 = vpop.permute.xlu0 %682 }
  0xaf   : > { %v685_v8 = vunpack.i.h.bf16 %v683_v7  ;;  %v684_v9 = vunpack.i.l.bf16 %v683_v7 }
  0xb1   : > { %v311_v11 = vsel %vm310_vm1, %v684_v9, %v685_v8 }
  0xb2   : > { %v610_v12 = vpack.c.bf16 %v311_v11, %v302_v0  ;;  %v314_v13 = vpop.permute.xlu0 %313 }
  0xb3   : > { %v318_v14 = vsel %vm317_vm2, %v314_v13, %v316_v10 }
  0xb4   : > { %611 = vmatprep.subr.bf16.mxu0 %v610_v12 }
  0xb5   : > { %613 = vmatpush3.bf16.msra.mxu0 %v610_v12 }
  0xb6   : > { %605 = vmatprep.subr.mxu0 %v318_v14 }
  0xb9   : > { %606 = vmatpush3.msra.mxu0 %v318_v14 }
  0xba   : > { %608 = vmatmul.mubr.msk.f32.vlgmr.msra.gmra.mrb[0].mxu0 %vm334_vm0, %v321_v15 }
  0xbd   : > { %v327_v17 = vpop.permute.xlu1 %326 }
  0xc3   : > { %v332_v16 = vpop.permute.xlu0 %331 }
 0x18d   : > { %v609_v18 = vpop.f32.mrb[0].mxu0 }
 0x18e   : > { %v413_v19 = vadd.f32 %v609_v18, %v332_v16  ;;  %v407_v20 = vpop.f32.mrb[1].mxu0 }
 0x18f   : > { %v408_v21 = vadd.f32 %v407_v20, %v327_v17 }
 0x190   : > { %417 = vst [vmem:[%s274_s29 + $0x8] sm:$0xff] %v413_v19 }
 0x191   : > { %416 = vst [vmem:[%s274_s29] sm:$0xff] %v408_v21 }
 0x192   : > { %731 = shalt.err (!%p728_p6)
}
 0x193   : > { %s732_s19 = scalar_lea.hbm %s972_s6, 256  ;;  %s736_s22 = scalar_lea.hbm %s1024_s3, 512 }
 0x194   : > { %p733_p4 = scmp.ne.s32.totalorder %s972_s6, %s732_s19  ;;  %p737_p1 = scmp.lt.u32.totalorder %s972_s6, %s1024_s3 }
 0x195   : > { %p738_p2 = scmp.lt.u32.totalorder %s736_s22, %s732_s19  ;;  %p740_p8 = scmp.lt.u32.totalorder %s732_s19, %s972_s6 }
 0x196   : > { %p734_p10 = pnand %p733_p4, %p1033_p9 }
 0x197   : > { %p739_p5 = por %p738_p2, %p737_p1 }
 0x198   : > { %p735_p12 = pneg %p734_p10 }
 0x199   : > { %p741_p11 = por %p740_p8, %p739_p5 }
 0x19b   : > { %p742_p0 = pnand %p741_p11, %p735_p12 }
 0x19d   : > { %745 = shalt.err (!%p742_p0)
}
 0x19e   : > { %s807_s29 = smov 128   ;;  %s808_s4 = smov 8  }
 0x19f   : > { %616 = dma.vmem_to_hbm [thread:$0]  (%p1033_p9), %s967_s30, 256, %s972_s6, %s419_s7, %s807_s29, %s807_s29, %s808_s4  }
 0x1a0 PF: > { %s451_s11 = sand.u32 1, %s780_s12   ;;  %p1034_p7 = scmp.ne.s32.totalorder %s1029_s27, 0 }
 0x1a1   : > { %p1035_p13 = scmp.ge.s32.totalorder %s800_s17, 2  ;;  %s452_s9 = scalar_lea.sflag [#allocation4], %s451_s11 }
 0x1a3   : > { %p623_p3 = pnand %p1035_p13, %p1034_p7 }
 0x1a5   : > { %775 = dma.done.wait (!%p623_p3), %s452_s9, 256  }
 0x1a6   : > { %777 = vsyncadd (!%p623_p3), %s452_s9, 4294967040  ;;  %s19_s17 = sadd.s32 1, %s800_s17   ;;  %s1036_s12 = smov %s784_s13 }
 0x1a7   : > { %p16_p6 = scmp.ge.s32.totalorder %s19_s17, 4   ;;  %s1037_s13 = smov %s788_s14 }
 0x1a8   : > { %s1038_s14 = smov %s885_s26  ;;  %s1039_s15 = smov %s796_s16 }
 0x1a9   : > { %s1040_s16 = smov %s1042_s20  ;;  %18 = sbr.rel (!%p16_p6) target bundleno = 6 (0x6), region = 84 }
 0x1b0   :  { %457 = vsyncpa [#allocation3], 1 }
 0x1b1   :  { %459 = vsyncpa [#allocation3 + $0x1], 1 }
 0x1b2   :  { %460 = vsyncpa [#allocation4], 1 }
 0x1b3   :  { %462 = vsyncpa [#allocation4 + $0x1], 1 }

</bundles_post_ra>
